<compile_context>
chip_gen: v7x
topology: tpu7x:2x2x1
jax: 0.10.0
libtpu: 0.0.40
codegen_flags: <defaults>
</compile_context>

<pallas_src>
import numpy as np
import jax
import jax.numpy as jnp
from jax.experimental import pallas as pl
from jax.experimental.pallas import tpu as pltpu


# ----------------------------------------------------------------------------
# Fused kernel:  out[b, :] = (w . feats[b]) @ K^T + bias
#   - batched channel reduce == 1x1 conv (tMod) over 768 channels   (MXU)
#   - @ K^T, K = kron(A_h, A_w) == bicubic upsample                 (MXU)
# ----------------------------------------------------------------------------
def fused_kernel(bias_ref, feats_ref, w_ref, kt_ref, o_ref, y_scr):
    # bias_ref : (1, 1)      f32   SMEM   conv bias (scalar)
    # feats_ref: (B, hw, C)  bf16  VMEM   backbone features, C last (lane-dense)
    # w_ref    : (1, C)      bf16  VMEM   1x1 conv weight
    # kt_ref   : (hw, HW)    bf16  VMEM   kron(A_h, A_w)^T bicubic matrix
    # o_ref    : (B, HW)     f32   VMEM   lane-dense output slab (HW % 128 == 0)
    # y_scr    : (B, 1, hw)  f32   VMEM   tiny scratch for the conv intermediate
    B, hw, C = feats_ref.shape

    # --- 1x1 conv over channels: all B images in one batched dot_general ----
    w_b = jnp.broadcast_to(w_ref[...], (B, 1, C))                  # hoisted, tiny
    y3 = jnp.einsum('bnc,bkc->bnk', w_b, feats_ref[...],
                    preferred_element_type=jnp.float32)            # (B, 1, hw) f32

    # Tiny VMEM bounce (B*hw f32 = 128 B) so the (B,1,hw) -> (B,hw) squeeze is
    # a plain ref-indexed load (always supported) instead of a value relayout.
    y_scr[...] = y3
    y = y_scr[:, 0, :].astype(jnp.bfloat16)                        # (B, hw) bf16

    # --- bicubic upsample: ONE MXU matmul, M=B, lane-dense N=HW --------------
    out = jnp.dot(y, kt_ref[...], preferred_element_type=jnp.float32)  # (B, HW)

    # kron(A_h, A_w) rows sum to 1, so adding the conv bias after the
    # interpolation is mathematically identical to adding it before.
    o_ref[...] = out + bias_ref[0, 0]


# ----------------------------------------------------------------------------
# Bicubic interpolation matrix matching F.interpolate(mode='bicubic',
# align_corners=False): a = -0.75, index clamping at borders (rows sum to 1).
# ----------------------------------------------------------------------------
def _cubic_weight(x, a=-0.75):
    x = abs(float(x))
    if x <= 1.0:
        return (a + 2.0) * x**3 - (a + 3.0) * x**2 + 1.0
    elif x < 2.0:
        return a * x**3 - 5.0 * a * x**2 + 8.0 * a * x - 4.0 * a
    return 0.0


def bicubic_matrix(out_size, in_size):
    scale = in_size / out_size
    A = np.zeros((out_size, in_size), dtype=np.float32)
    for o in range(out_size):
        src = (o + 0.5) * scale - 0.5
        f = int(np.floor(src))
        t = src - f
        taps = [(f - 1, _cubic_weight(t + 1.0)),
                (f + 0, _cubic_weight(t)),
                (f + 1, _cubic_weight(1.0 - t)),
                (f + 2, _cubic_weight(2.0 - t))]
        for idx, wgt in taps:
            A[o, min(max(idx, 0), in_size - 1)] += wgt
    return A


# ----------------------------------------------------------------------------
# Wrapper: flatten -> tMod(1x1 conv) -> bicubic upsample, fused in one call.
# ----------------------------------------------------------------------------
def uda_crack_infer(feats, w, bias, kT, train_size):
    # feats: (B, C, hw) backbone (sMod) output tokens; returns (B, 1, H, W)
    B, C, hw = feats.shape
    HW = train_size * train_size
    assert kT.shape == (hw, HW)
    assert HW % 128 == 0, "output slab must stay lane-dense"

    feats_t = jnp.transpose(feats, (0, 2, 1)).astype(jnp.bfloat16)  # (B, hw, C)
    w_bf = w.astype(jnp.bfloat16)                                   # (1, C)
    kt_bf = kT.astype(jnp.bfloat16)                                 # (hw, HW)
    bias_f32 = bias.reshape(1, 1).astype(jnp.float32)

    out_flat = pl.pallas_call(
        fused_kernel,
        out_shape=jax.ShapeDtypeStruct((B, HW), jnp.float32),
        in_specs=[
            pl.BlockSpec(memory_space=pltpu.MemorySpace.SMEM),   # bias scalar
            pl.BlockSpec(memory_space=pltpu.MemorySpace.VMEM),   # feats (B,hw,C)
            pl.BlockSpec(memory_space=pltpu.MemorySpace.VMEM),   # conv weight
            pl.BlockSpec(memory_space=pltpu.MemorySpace.VMEM),   # kron(A_h,A_w)^T
        ],
        out_specs=pl.BlockSpec(memory_space=pltpu.MemorySpace.VMEM),
        scratch_shapes=[pltpu.VMEM((B, 1, hw), jnp.float32)],
    )(bias_f32, feats_t, w_bf, kt_bf)

    # back to NCHW: (B, 1, H, W)  (row-major flatten matches kron ordering)
    return out_flat.reshape(B, 1, train_size, train_size)


if __name__ == "__main__":
    patch_size = 8
    train_size = 32                      # small demo; module default (48*8=384) scales the same math
    B = 2
    C = 768                              # fixed by tMod = Conv2d(768, 1, 1)
    g = train_size // patch_size         # 4 -> h*w = 16 patch tokens
    assert train_size % patch_size == 0

    key = jax.random.PRNGKey(0)
    k1, k2, k3 = jax.random.split(key, 3)

    # backbone (sMod) output features, shape (B, 768, num_patches)
    feats = jax.random.normal(k1, (B, C, g * g), dtype=jnp.float32)

    # tMod parameters: Conv2d(768, 1, kernel_size=1) -> weight (1, 768, 1, 1), bias (1,)
    w_conv = jax.random.normal(k2, (1, C), dtype=jnp.float32) / np.sqrt(C)
    b_conv = jax.random.normal(k3, (1, 1), dtype=jnp.float32) * 0.01

    # precomputed combined bicubic interpolation matrix K^T = kron(A_h, A_w)^T
    A = bicubic_matrix(train_size, g)            # (H, g); square case: A_h == A_w
    K = np.kron(A, A)                            # (H*W, g*g)
    kT = jnp.asarray(K.T, dtype=jnp.float32)     # (g*g, H*W)

    out = uda_crack_infer(feats, w_conv, b_conv, kT, train_size)
    out = jax.block_until_ready(out)
    assert out.shape == (B, 1, train_size, train_size)
    assert bool(jnp.all(jnp.isfinite(out)))
    print("KERNEL_OK")
</pallas_src>

<mosaic_0001>
module attributes {stable_mosaic.version = 11 : i64} {
  func.func @fused_kernel(%arg0: memref<1x1xf32, #tpu.memory_space<smem>>, %arg1: memref<2x16x768xbf16, #tpu.memory_space<vmem>>, %arg2: memref<1x768xbf16, #tpu.memory_space<vmem>>, %arg3: memref<16x1024xbf16, #tpu.memory_space<vmem>>, %arg4: memref<2x1024xf32, #tpu.memory_space<vmem>>, %arg5: memref<2x1x16xf32, #tpu.memory_space<vmem>>) attributes {dimension_semantics = [], scalar_prefetch = 0 : i64, scratch_operands = 1 : i64, tpu.core_type = #tpu.core_type<tc>} {
    %c0 = arith.constant 0 : index
    %c0_0 = arith.constant 0 : index
    %0 = vector.load %arg2[%c0, %c0_0] : memref<1x768xbf16, #tpu.memory_space<vmem>>, vector<1x768xbf16>
    %1 = vector.shape_cast %0 : vector<1x768xbf16> to vector<1x1x768xbf16>
    %2 = vector.broadcast %1 : vector<1x1x768xbf16> to vector<2x1x768xbf16>
    %c0_1 = arith.constant 0 : index
    %c0_2 = arith.constant 0 : index
    %c0_3 = arith.constant 0 : index
    %3 = vector.load %arg1[%c0_1, %c0_2, %c0_3] : memref<2x16x768xbf16, #tpu.memory_space<vmem>>, vector<2x16x768xbf16>
    "tpu.trace_start"() <{level = 10 : i32, message = "bnc,bkc->bnk"}> : () -> ()
    %cst = arith.constant dense<0.000000e+00> : vector<2x1x16xf32>
    %4 = tpu.matmul %2, %3, %cst {dimension_numbers = #tpu.dot_dimension_numbers<[2], [2], [1], [1], [0, 0, 0, 1, 1, 1], [0], [0]>} : vector<2x1x768xbf16>, vector<2x16x768xbf16>, vector<2x1x16xf32> -> vector<2x1x16xf32>
    "tpu.trace_stop"() : () -> ()
    %c0_4 = arith.constant 0 : index
    %c0_5 = arith.constant 0 : index
    %c0_6 = arith.constant 0 : index
    %5 = vector.load %arg5[%c0_4, %c0_5, %c0_6] : memref<2x1x16xf32, #tpu.memory_space<vmem>>, vector<2x1x16xf32>
    tpu.vector_store %arg5[%c0_4, %c0_5, %c0_6], %4 {strides = array<i32>} : memref<2x1x16xf32, #tpu.memory_space<vmem>>, vector<2x1x16xf32>,
    %c0_7 = arith.constant 0 : index
    %c0_8 = arith.constant 0 : index
    %c0_9 = arith.constant 0 : index
    %6 = vector.load %arg5[%c0_7, %c0_8, %c0_9] : memref<2x1x16xf32, #tpu.memory_space<vmem>>, vector<2x1x16xf32>
    %7 = vector.shape_cast %6 : vector<2x1x16xf32> to vector<2x16xf32>
    %8 = arith.truncf %7 : vector<2x16xf32> to vector<2x16xbf16>
    %c0_10 = arith.constant 0 : index
    %c0_11 = arith.constant 0 : index
    %9 = vector.load %arg3[%c0_10, %c0_11] : memref<16x1024xbf16, #tpu.memory_space<vmem>>, vector<16x1024xbf16>
    %cst_12 = arith.constant dense<0.000000e+00> : vector<2x1024xf32>
    %10 = tpu.matmul %8, %9, %cst_12 {dimension_numbers = #tpu.dot_dimension_numbers<[1], [0], [0], [1], [0, 0, 1, 1], [], []>} : vector<2x16xbf16>, vector<16x1024xbf16>, vector<2x1024xf32> -> vector<2x1024xf32>
    %c0_13 = arith.constant 0 : index
    %c0_14 = arith.constant 0 : index
    %11 = memref.load %arg0[%c0_13, %c0_14] : memref<1x1xf32, #tpu.memory_space<smem>>
    %12 = vector.broadcast %11 : f32 to vector<2x1024xf32>
    %13 = arith.addf %10, %12 : vector<2x1024xf32>
    %c0_15 = arith.constant 0 : index
    %c0_16 = arith.constant 0 : index
    %14 = vector.load %arg4[%c0_15, %c0_16] : memref<2x1024xf32, #tpu.memory_space<vmem>>, vector<2x1024xf32>
    tpu.vector_store %arg4[%c0_15, %c0_16], %13 {strides = array<i32>} : memref<2x1024xf32, #tpu.memory_space<vmem>>, vector<2x1024xf32>,
    return
  }
}

</mosaic_0001>

<bundles_post_ra>
// kernel: tpu_custom_call.1
= control target key start
LH: loop header
LB: loop body
LE: loop exit
PB: predicated region body
PF: predicated region fallthrough
CT: control target
= control target key end

     0   :  { %10 = vsyncpa [#allocation5], 0  ;;  %s932_s0 = inlined_call_operand.<no memory space> [shape: f32[1,1], index: 0, kind: input, shape index: {}]   ;;  %s933_s1 = inlined_call_operand.hbm [shape: bf16[2,16,768], index: 1, kind: input, shape index: {}]   ;;  %s934_s2 = inlined_call_operand.vmem [shape: bf16[1,768], index: 2, kind: input, shape index: {}]   ;;  %s935_s3 = inlined_call_operand.hbm [shape: bf16[16,1024], index: 3, kind: input, shape index: {}]   ;;  %s936_s4 = inlined_call_operand.hbm [shape: f32[2,1024], index: 4, kind: output, shape index: {}]  }
   0x1   :  { %11 = vsyncpa [#allocation8], 0 }
   0x2   :  { %12 = vsyncpa [#allocation6], 0  ;;  %s851_s15 = smov [#allocation4]   ;;  %s779_s19 = scalar_lea.hbm %s933_s1, 1536 }
   0x3   :  { %s20_s16 = sshll.u32 %s851_s15, 4  ;;  %p780_p0 = scmp.ne.s32.totalorder %s933_s1, %s779_s19  ;;  %s21_s16 = int_to_ptr.vmem [resolvable:$true] %s20_s16 }
   0x4   :  { %p783_p1 = scmp.lt.u32.totalorder %s779_s19, %s933_s1 }
   0x6   :  { %p785_p2 = pnand %p783_p1, %p780_p0 }
   0x8   :  { %788 = shalt.err (!%p785_p2)
}
   0x9   :  { %s789_s24 = scalar_lea.vmem %s21_s16, 1536  ;;  %p794_p4 = scmp.lt.s32.totalorder %s21_s16, %s21_s16 }
   0xa   :  { %p790_p3 = scmp.ne.s32.totalorder %s21_s16, %s789_s24  ;;  %p795_p5 = scmp.lt.s32.totalorder %s789_s24, %s789_s24 }
   0xc   :  { %p796_p6 = por %p795_p5, %p794_p4 }
   0xe   :  { %p797_p7 = pnand %p796_p6, %p790_p3 }
  0x10   :  { %800 = shalt.err (!%p797_p7)
}
  0x11   :  { %s852_s25 = smov 384   ;;  %s853_s26 = smov 24  }
  0x12   :  { %26 = dma.hbm_to_vmem [thread:$0]  %s933_s1, 1536, %s21_s16, [#allocation5], %s852_s25, %s852_s25, %s853_s26  }
  0x13   :  { %s854_s29 = smov [#allocation7]   ;;  %s801_s7 = scalar_lea.hbm %s935_s3, 1024 }
  0x14   :  { %s34_s30 = sshll.u32 %s854_s29, 4  ;;  %p802_p8 = scmp.ne.s32.totalorder %s935_s3, %s801_s7  ;;  %s35_s30 = int_to_ptr.vmem [resolvable:$true] %s34_s30 }
  0x15   :  { %p805_p9 = scmp.lt.u32.totalorder %s801_s7, %s935_s3 }
  0x17   :  { %p807_p10 = pnand %p805_p9, %p802_p8 }
  0x19   :  { %810 = shalt.err (!%p807_p10)
}
  0x1a   :  { %s811_s12 = scalar_lea.vmem %s35_s30, 1024  ;;  %p816_p12 = scmp.lt.s32.totalorder %s35_s30, %s35_s30 }
  0x1b   :  { %p812_p11 = scmp.ne.s32.totalorder %s35_s30, %s811_s12  ;;  %p817_p13 = scmp.lt.s32.totalorder %s811_s12, %s811_s12 }
  0x1d   :  { %p818_p0 = por %p817_p13, %p816_p12 }
  0x1f   :  { %p819_p1 = pnand %p818_p0, %p812_p11 }
  0x21   :  { %822 = shalt.err (!%p819_p1)
}
  0x22   :  { %s855_s1 = smov 512   ;;  %s856_s13 = smov 32  }
  0x23   :  { %40 = dma.hbm_to_vmem [thread:$0]  %s935_s3, 1024, %s35_s30, [#allocation8], %s855_s1, %s855_s1, %s856_s13  }
  0x24   :  { %845 = dma.done.wait [#allocation5], 1536  }
  0x25   :  { %846 = vsyncadd [#allocation5], 4294965760 }
  0x26   :  { %847 = dma.done.wait [#allocation8], 1024  }
  0x27   :  { %848 = vsyncadd [#allocation8], 4294966272  ;;  %v66_v0 = vlaneseq  ;;  %v857_v1 = vmov 1966171168   ;;  %v760_v6 = vld [vmem:[#allocation4 + $0x4] ss:$24 sps:$4 sm:$0xff]  }
  0x28   :  { %v64_v2 = vunpack.c.l.s4 %v857_v1  ;;  %v762_v7 = vld [vmem:[#allocation4 + $0x34] ss:$24 sps:$4 sm:$0xff]   ;;  %145 = vmatprep.subr.bf16.mxu0 %v760_v6  ;;  %v764_v8 = vld [vmem:[#allocation4] ss:$24 sps:$4 sm:$0xff]   ;;  %v765_v9 = vld [vmem:[#allocation4 + $0x30] ss:$24 sps:$4 sm:$0xff]  }
  0x29   :  { %v910_v3 = vshrl.u32 %v66_v0, 7  ;;  %v48_v10 = vld [vmem:[%s934_s2] sm:$0x3f]  ;;  %295 = vmatprep.subr.bf16.mxu1 %v762_v7  ;;  %146 = vmatpush1.bf16.xpose.msra.mxu0 %v764_v8  ;;  %v771_v14 = vld [vmem:[#allocation4 + $0xc] ss:$24 sps:$4 sm:$0xff]   ;;  %v858_v36 = vmov 0  }
  0x2a   :  { %v65_v4 = vunpack.c.0.s8 %v64_v2  ;;  %296 = vmatpush1.bf16.xpose.msra.mxu1 %v765_v9  ;;  %v768_v12 = vld [vmem:[#allocation4 + $0x3c] ss:$24 sps:$4 sm:$0xff]   ;;  %185 = vmatprep.subr.bf16.mxu0 %v771_v14  ;;  %v766_v17 = vld [vmem:[#allocation4 + $0x38] ss:$24 sps:$4 sm:$0xff]   ;;  %v769_v18 = vld [vmem:[#allocation4 + $0x8] ss:$24 sps:$4 sm:$0xff]   ;;  %v62_v20 = vcombine.high %v48_v10, %v48_v10  ;;  %v431_v2 = vstv %s932_s0 }
  0x2b   :  { %335 = vmatprep.subr.bf16.mxu1 %v768_v12  ;;  %v774_v21 = vld [vmem:[#allocation4 + $0x44] ss:$24 sps:$4 sm:$0xff]   ;;  %v777_v22 = vld [vmem:[#allocation4 + $0x14] ss:$24 sps:$4 sm:$0xff]   ;;  %v772_v26 = vld [vmem:[#allocation4 + $0x40] ss:$24 sps:$4 sm:$0xff]  }
  0x2c   :  { %v68_v5 = vsub.s32 %v65_v4, %v910_v3  ;;  %v775_v27 = vld [vmem:[#allocation4 + $0x10] ss:$24 sps:$4 sm:$0xff]   ;;  %v422_v30 = vld [vmem:[#allocation7] sm:$0xff]  ;;  %v425_v41 = vld [vmem:[#allocation7 + $0x18] sm:$0xff]  ;;  %vm415_vm0 = vcmask 122880   ;;  %vm437_vm1 = vcmask 1041409  }
  0x2d   :  { %v426_v31 = vld [vmem:[#allocation7 + $0x20] sm:$0xff]  ;;  %v423_v32 = vld [vmem:[#allocation7 + $0x8] sm:$0xff]  ;;  %v424_v39 = vld [vmem:[#allocation7 + $0x10] sm:$0xff]  ;;  %vm480_vm2 = vcmask 130048   ;;  %v859_v0 = vmov 1983009808  }
  0x2e   :  { %v69_v11 = vrot.slane %v48_v10, %v68_v5  ;;  %v76_v23 = vrot.slane %v62_v20, %v68_v5  ;;  %v722_v33 = vcombine.low %v422_v30, %v426_v31  ;;  %v723_v34 = vcombine.high %v422_v30, %v426_v31  ;;  %v427_v35 = vld [vmem:[#allocation7 + $0x28] sm:$0xff]  ;;  %v428_v40 = vld [vmem:[#allocation7 + $0x30] sm:$0xff]  ;;  %v429_v44 = vld [vmem:[#allocation7 + $0x38] sm:$0xff]  ;;  %s860_s0 = smov [#allocation9]  }
  0x2f   :  { %v724_v37 = vcombine.low %v423_v32, %v427_v35  ;;  %v725_v38 = vcombine.high %v423_v32, %v427_v35  ;;  %v726_v42 = vcombine.low %v424_v39, %v428_v40  ;;  %v727_v43 = vcombine.high %v424_v39, %v428_v40  ;;  %s700_s18 = sshll.u32 %s860_s0, 4  ;;  %s701_s18 = int_to_ptr.vmem [resolvable:$true] %s700_s18 }
  0x30   :  { %v77_v13 = vcombine.high %v69_v11, %v69_v11  ;;  %v85_v16 = vrot.slane %v69_v11, %v68_v5  ;;  %v78_v24 = vcombine.high %v76_v23, %v76_v23  ;;  %v92_v29 = vrot.slane %v76_v23, %v68_v5  ;;  %s823_s19 = scalar_lea.vmem %s701_s18, 256  ;;  %p828_p3 = scmp.lt.s32.totalorder %s701_s18, %s701_s18 }
  0x31   :  { %v728_v45 = vcombine.low %v425_v41, %v429_v44  ;;  %v729_v46 = vcombine.high %v425_v41, %v429_v44  ;;  %v659_v1 = vunpack.c.l.s4 %v859_v0  ;;  %p824_p2 = scmp.ne.s32.totalorder %s701_s18, %s823_s19  ;;  %p829_p4 = scmp.lt.s32.totalorder %s823_s19, %s823_s19 }
  0x32   :  { %v99_v15 = vrot.slane %v77_v13, %v68_v5  ;;  %v107_v25 = vcombine.high %v85_v16, %v85_v16  ;;  %v106_v28 = vrot.slane %v78_v24, %v68_v5 }
  0x33   :  { %v660_v4 = vunpack.c.0.s8 %v659_v1  ;;  %p830_p5 = por %p829_p4, %p828_p3 }
  0x34   :  { %177 = vmatprep.mubr.bf16.mxu0 %v99_v15  ;;  %327 = vmatprep.mubr.bf16.mxu1 %v99_v15  ;;  %v108_v19 = vcombine.high %v99_v15, %v99_v15 }
  0x35   :  { %178 = vmatmul.mubr.bf16.vlgmr.msra.gmra.mrb[0].mxu0 %v85_v16  ;;  %328 = vmatmul.mubr.bf16.vlgmr.msra.gmra.mrb[0].mxu1 %v85_v16  ;;  %v663_v12 = vsub.s32 %v660_v4, %v910_v3  ;;  %p831_p6 = pnand %p830_p5, %p824_p2 }
  0x36   :  { %336 = vmatpush1.bf16.xpose.msra.mxu1 %v766_v17  ;;  %186 = vmatpush1.bf16.xpose.msra.mxu0 %v769_v18 }
  0x37   :  { %217 = vmatprep.mubr.bf16.mxu0 %v108_v19  ;;  %367 = vmatprep.mubr.bf16.mxu1 %v108_v19 }
  0x38   :  { %375 = vmatprep.subr.bf16.mxu1 %v774_v21  ;;  %225 = vmatprep.subr.bf16.mxu0 %v777_v22 }
  0x41   :  { %218 = vmatmul.mubr.bf16.vlgmr.msra.gmra.mrb[0].mxu0 %v107_v25  ;;  %368 = vmatmul.mubr.bf16.vlgmr.msra.gmra.mrb[0].mxu1 %v107_v25 }
  0x42   :  { %376 = vmatpush1.bf16.xpose.msra.mxu1 %v772_v26  ;;  %226 = vmatpush1.bf16.xpose.msra.mxu0 %v775_v27 }
  0x43   :  { %257 = vmatprep.mubr.bf16.mxu0 %v106_v28  ;;  %407 = vmatprep.mubr.bf16.mxu1 %v106_v28 }
  0x44   :  { %484 = vmatprep.subr.bf16.mxu0 %v723_v34  ;;  %525 = vmatprep.subr.bf16.mxu1 %v725_v38 }
  0x4d   :  { %258 = vmatmul.mubr.bf16.vlgmr.msra.gmra.mrb[0].mxu0 %v92_v29  ;;  %408 = vmatmul.mubr.bf16.vlgmr.msra.gmra.mrb[0].mxu1 %v92_v29 }
  0x4e   :  { %516 = vmatprep.mubr.bf16.mxu0 %v858_v36  ;;  %557 = vmatprep.mubr.bf16.mxu1 %v858_v36 }
  0x4f   :  { %485 = vmatpush1.bf16.msra.mxu0 %v722_v33  ;;  %526 = vmatpush1.bf16.msra.mxu1 %v724_v37 }
  0x50   :  { %566 = vmatprep.subr.bf16.mxu0 %v727_v43  ;;  %607 = vmatprep.subr.bf16.mxu1 %v729_v46 }
 0x120   :  { %v259_v47 = vpop.f32.mrb[0].mxu0  ;;  %v409_v48 = vpop.f32.mrb[0].mxu1 }
 0x121   :  { %416 = vst.msk [vmem:[#allocation2] sm:$0x1] %vm415_vm0, %v259_v47  ;;  %417 = vst.msk [vmem:[#allocation2 + $0x1] sm:$0x1] %vm415_vm0, %v409_v48  ;;  %v261_v49 = vpop.f32.mrb[1].mxu0  ;;  %v411_v50 = vpop.f32.mrb[1].mxu1 }
 0x122   :  { %v262_v51 = vpop.f32.mrb[2].mxu0  ;;  %v412_v52 = vpop.f32.mrb[2].mxu1 }
 0x123   :  { %v263_v53 = vpop.f32.mrb[3].mxu0  ;;  %v413_v54 = vpop.f32.mrb[3].mxu1 }
 0x128   :  { %v418_v55 = vld [vmem:[#allocation2] sm:$0x1]  ;;  %v419_v56 = vld [vmem:[#allocation2 + $0x1] sm:$0x1] }
 0x129   :  { %v420_v57 = vpack.c.bf16 %v418_v55, %v418_v55  ;;  %v421_v58 = vpack.c.bf16 %v419_v56, %v419_v56 }
 0x12b   :  { %v435_v59 = vunpack.c.l.b16 %v421_v58  ;;  %v434_v60 = vunpack.c.l.b16 %v420_v57 }
 0x12d   :  { %v436_v61 = vrot.slane %v435_v59, 7 }
 0x12f   :  { %v438_v62 = vsel %vm437_vm1, %v436_v61, %v434_v60 }
 0x130   :  { %v439_v63 = vpack.c.b16 %v438_v62, %v438_v62 }
 0x132   :  { %730 = vmatmul.mubr.msk.bf16.vlgmr.msra.gmra.mrb[4].mxu0 %vm480_vm2, %v439_v63  ;;  %731 = vmatmul.mubr.msk.bf16.vlgmr.msra.gmra.mrb[4].mxu1 %vm480_vm2, %v439_v63 }
 0x133   :  { %567 = vmatpush1.bf16.msra.mxu0 %v726_v42  ;;  %608 = vmatpush1.bf16.msra.mxu1 %v728_v45 }
 0x134   :  { %598 = vmatprep.mubr.bf16.mxu0 %v858_v36  ;;  %639 = vmatprep.mubr.bf16.mxu1 %v858_v36 }
 0x13a   :  { %732 = vmatmul.mubr.msk.bf16.vlgmr.msra.gmra.mrb[8].mxu0 %vm480_vm2, %v439_v63  ;;  %733 = vmatmul.mubr.msk.bf16.vlgmr.msra.gmra.mrb[8].mxu1 %vm480_vm2, %v439_v63 }
 0x205   :  { %v518_v5 = vpop.f32.mrb[4].mxu0  ;;  %v559_v6 = vpop.f32.mrb[4].mxu1 }
 0x206   :  { %v519_v7 = vadd.f32 %v518_v5, %v431_v2  ;;  %v560_v8 = vadd.f32 %v559_v6, %v431_v2  ;;  %v520_v9 = vpop.f32.mrb[5].mxu0  ;;  %v561_v10 = vpop.f32.mrb[5].mxu1 }
 0x207   :  { %v521_v11 = vadd.f32 %v520_v9, %v431_v2  ;;  %v562_v13 = vadd.f32 %v561_v10, %v431_v2  ;;  %v522_v14 = vpop.f32.mrb[6].mxu0  ;;  %v563_v15 = vpop.f32.mrb[6].mxu1 }
 0x208   :  { %v523_v16 = vpop.f32.mrb[7].mxu0  ;;  %v564_v17 = vpop.f32.mrb[7].mxu1 }
 0x209   :  { %v656_v18 = vcombine.low %v519_v7, %v521_v11  ;;  %v657_v19 = vcombine.low %v560_v8, %v562_v13 }
 0x20b   :  { %v664_v20 = vrot.slane %v656_v18, %v663_v12  ;;  %v671_v21 = vrot.slane %v657_v19, %v663_v12 }
 0x20d   :  { %v600_v22 = vpop.f32.mrb[8].mxu0  ;;  %v641_v23 = vpop.f32.mrb[8].mxu1  ;;  %v672_v24 = vcombine.low %v664_v20, %v671_v21 }
 0x20e   :  { %v601_v25 = vadd.f32 %v600_v22, %v431_v2  ;;  %v642_v26 = vadd.f32 %v641_v23, %v431_v2  ;;  %v602_v27 = vpop.f32.mrb[9].mxu0  ;;  %v643_v28 = vpop.f32.mrb[9].mxu1 }
 0x20f   :  { %v603_v29 = vadd.f32 %v602_v27, %v431_v2  ;;  %v644_v30 = vadd.f32 %v643_v28, %v431_v2  ;;  %v604_v31 = vpop.f32.mrb[10].mxu0  ;;  %v645_v3 = vpop.f32.mrb[10].mxu1  ;;  %692 = vst [vmem:[#allocation9] sm:$0xff] %v672_v24 }
 0x210   :  { %v605_v32 = vpop.f32.mrb[11].mxu0  ;;  %v646_v33 = vpop.f32.mrb[11].mxu1 }
 0x211   :  { %v673_v34 = vcombine.low %v601_v25, %v603_v29  ;;  %v674_v35 = vcombine.low %v642_v26, %v644_v30 }
 0x213   :  { %v681_v36 = vrot.slane %v673_v34, %v663_v12  ;;  %v688_v37 = vrot.slane %v674_v35, %v663_v12 }
 0x215   :  { %v689_v38 = vcombine.low %v681_v36, %v688_v37 }
 0x217   :  { %693 = vst [vmem:[#allocation9 + $0x8] sm:$0xff] %v689_v38 }
 0x218   :  { %834 = shalt.err (!%p831_p6)
}
 0x219   :  { %s835_s22 = scalar_lea.hbm %s936_s4, 256 }
 0x21a   :  { %p836_p7 = scmp.ne.s32.totalorder %s936_s4, %s835_s22  ;;  %p839_p8 = scmp.lt.u32.totalorder %s835_s22, %s936_s4 }
 0x21c   :  { %p841_p9 = pnand %p839_p8, %p836_p7 }
 0x21e   :  { %844 = shalt.err (!%p841_p9)
}
 0x21f   :  { %703 = dma.vmem_to_hbm [thread:$0]  %s701_s18, 256, %s936_s4, [#allocation6]  }
 0x220   :  { %849 = dma.done.wait [#allocation6], 256  }
 0x221   :  { %850 = vsyncadd [#allocation6], 4294967040 }
 0x222   :  { %707 = vsyncpa [#allocation5], 1 }
 0x223   :  { %708 = vsyncpa [#allocation8], 1 }
 0x224   :  { %709 = vsyncpa [#allocation6], 1 }

</bundles_post_ra>
